<compile_context>
chip_gen: v5e
topology: v5e:2x2
jax: 0.10.0
libtpu: 0.0.40
codegen_flags: <defaults>
</compile_context>

<pallas_src>
import math
import jax
import jax.numpy as jnp
from jax.experimental import pallas as pl
from jax.experimental.pallas import tpu as pltpu


_HIDDEN = (512, 256, 128, 64)
_TB_CAP = 2048            # max batch rows per grid step (fits v7x 64 MiB VMEM)
# Packed-parameter layout (1, 1152) f32, 1152 = 9*128 lanes:
#   [0:512]=b1  [512:768]=b2  [768:896]=b3  [896:960]=b4
#   [1024:1088]=fc5 weight row (64)  [1088]=b5
_P_TOT = 1152


def _round_up(v, m):
    return ((v + m - 1) // m) * m


def _epilogue_dtype():
    """bf16 epilogue on chips with a bf16 VPU (v6e/v7x); f32 otherwise (v5e)."""
    try:
        kind = jax.devices()[0].device_kind.lower()
    except Exception:
        return jnp.float32
    return jnp.bfloat16 if ("v6" in kind or "v7" in kind) else jnp.float32


def _make_kernel(epi_dtype):
    def kernel(x_ref, w1_ref, w2_ref, w3_ref, w4_ref, p_ref, o_ref):
        # x_ref : (TB, in_pad) bf16            w1..w4 : bf16, (in, out) layout
        # p_ref : (1, 1152) f32 packed params  o_ref  : (TB, 1) f32
        def dense(h_bf16, w_ref, b_slice):
            acc = jnp.dot(h_bf16, w_ref[...],
                          preferred_element_type=jnp.float32)
            h = acc.astype(epi_dtype) + b_slice.astype(epi_dtype)
            # LeakyReLU(0.01): maximum() is one fewer VPU op than where().
            return jnp.maximum(h, 0.01 * h).astype(jnp.bfloat16)

        h = dense(x_ref[...], w1_ref, p_ref[:, 0:512])
        h = dense(h, w2_ref, p_ref[:, 512:768])
        h = dense(h, w3_ref, p_ref[:, 768:896])
        h = dense(h, w4_ref, p_ref[:, 896:960])
        # fc5 (64 -> 1): an N=1 MXU matmul wastes the systolic array; use a
        # VPU multiply + XLU lane reduction in f32 instead.
        w5 = p_ref[:, 1024:1088]                               # (1, 64) f32
        q = jnp.sum(h.astype(jnp.float32) * w5, axis=-1, keepdims=True)
        o_ref[...] = q + p_ref[:, 1088:1089]                   # + b5

    return kernel


def _xavier_uniform(key, out_f, in_f, gain=1.0):
    # Matches torch.nn.init.xavier_uniform_ on a (out_f, in_f) Linear weight.
    bound = gain * math.sqrt(6.0 / (in_f + out_f))
    return jax.random.uniform(key, (out_f, in_f), jnp.float32, -bound, bound)


def init_soft_q_params(key, input_shape, out_c):
    dims = [input_shape + out_c] + list(_HIDDEN) + [1]
    params = []
    for i, (in_f, out_f) in enumerate(zip(dims[:-1], dims[1:])):
        k = jax.random.fold_in(key, i)
        w = _xavier_uniform(k, out_f, in_f)      # PyTorch layout (out, in)
        b = jnp.zeros((out_f,), jnp.float32)     # bias_init='zeros'
        params.append((w, b))
    return params


def prepare_params(params, input_shape, out_c):
    """One-time weight prep (transpose / pad / bf16 cast), off the hot path."""
    in_dim = input_shape + out_c
    in_pad = _round_up(max(in_dim, 16), 16)      # lane-compact (e.g. 20 -> 32)
    (w1, b1), (w2, b2), (w3, b3), (w4, b4), (w5, b5) = params

    w1t = jnp.zeros((in_pad, 512), jnp.float32).at[:in_dim, :].set(w1.T)
    ws = (w1t.astype(jnp.bfloat16),
          w2.T.astype(jnp.bfloat16),
          w3.T.astype(jnp.bfloat16),
          w4.T.astype(jnp.bfloat16))

    packed = jnp.zeros((1, _P_TOT), jnp.float32)
    packed = packed.at[0, 0:512].set(b1)
    packed = packed.at[0, 512:768].set(b2)
    packed = packed.at[0, 768:896].set(b3)
    packed = packed.at[0, 896:960].set(b4)
    packed = packed.at[0, 1024:1088].set(w5.reshape(64))   # fc5 weight row
    packed = packed.at[0, 1088].set(b5[0])                  # fc5 bias

    return dict(ws=ws, packed=packed, in_dim=in_dim, in_pad=in_pad)


def soft_q_forward(x, action_c, prepped):
    """Pallas implementation of SoftQNetwork.forward."""
    assert x.ndim == 2 and action_c.ndim == 2
    B, obs_dim = x.shape
    act_dim = action_c.shape[1]
    in_dim, in_pad = prepped["in_dim"], prepped["in_pad"]
    assert obs_dim + act_dim == in_dim

    # Batch tiling: small batches run as one block; batches > 2048 split into
    # >= 2 near-equal blocks (keeps both v7x TCs busy, amortizes per-step
    # overhead on v5e/v6e, minimizes padded-row waste).
    B_pad = _round_up(max(B, 16), 16)
    if B_pad <= _TB_CAP:
        TB, n_blk = B_pad, 1
    else:
        n_blk = pl.cdiv(B_pad, _TB_CAP)
        TB = _round_up(pl.cdiv(B_pad, n_blk), 16)
        B_pad = TB * n_blk
    grid = (n_blk,)

    # Lane-compact bf16 input block: (obs | action | zero pad) -> 64 B/row.
    xp = jnp.zeros((B_pad, in_pad), jnp.bfloat16)
    xp = xp.at[:B, :obs_dim].set(x.astype(jnp.bfloat16))
    xp = xp.at[:B, obs_dim:in_dim].set(action_c.astype(jnp.bfloat16))

    w1t, w2t, w3t, w4t = prepped["ws"]
    packed = prepped["packed"]

    const = lambda i: (0, 0)
    in_specs = [
        pl.BlockSpec((TB, in_pad), lambda i: (i, 0)),   # x: batch-tiled
        pl.BlockSpec(w1t.shape, const),                 # weights stay resident
        pl.BlockSpec(w2t.shape, const),
        pl.BlockSpec(w3t.shape, const),
        pl.BlockSpec(w4t.shape, const),
        pl.BlockSpec(packed.shape, const),
    ]
    out_specs = pl.BlockSpec((TB, 1), lambda i: (i, 0))

    flops = 2 * B_pad * (in_pad * 512 + 512 * 256 + 256 * 128 + 128 * 64 + 64)
    bytes_accessed = (xp.size * 2
                      + (w1t.size + w2t.size + w3t.size + w4t.size) * 2
                      + packed.size * 4
                      + B_pad * 4)

    out_padded = pl.pallas_call(
        _make_kernel(_epilogue_dtype()),
        out_shape=jax.ShapeDtypeStruct((B_pad, 1), jnp.float32),
        grid=grid,
        in_specs=in_specs,
        out_specs=out_specs,
        compiler_params=pltpu.CompilerParams(
            dimension_semantics=("parallel",),
            vmem_limit_bytes=48 * 1024 * 1024),
        cost_estimate=pl.CostEstimate(flops=flops, transcendentals=0,
                                      bytes_accessed=bytes_accessed),
    )(xp, w1t, w2t, w3t, w4t, packed)

    return out_padded[:B, :]


if __name__ == "__main__":
    key = jax.random.PRNGKey(0)
    input_shape = 16   # observation feature size
    out_c = 4          # continuous action size
    batch = 2

    kx, ka, kp = jax.random.split(key, 3)
    x = jax.random.normal(kx, (batch, input_shape), jnp.float32)
    action_c = jax.random.normal(ka, (batch, out_c), jnp.float32)

    params = init_soft_q_params(kp, input_shape, out_c)
    prepped = prepare_params(params, input_shape, out_c)   # one-time prep

    q = jax.block_until_ready(soft_q_forward(x, action_c, prepped))
    assert q.shape == (batch, 1)

    epi_dtype = _epilogue_dtype()

    # Reference 1: replicates the kernel's dtype path exactly
    # (bf16 weights/activations, f32 MXU accumulation, epi_dtype epilogue).
    def ref_kernel_math(x, a, params):
        (w1, b1), (w2, b2), (w3, b3), (w4, b4), (w5, b5) = params
        h = jnp.concatenate([x, a], axis=1).astype(jnp.bfloat16)
        for w, b in [(w1, b1), (w2, b2), (w3, b3), (w4, b4)]:
            acc = jnp.dot(h, w.T.astype(jnp.bfloat16),
                          preferred_element_type=jnp.float32)
            t = acc.astype(epi_dtype) + b.astype(epi_dtype)
            h = jnp.maximum(t, 0.01 * t).astype(jnp.bfloat16)
        q = jnp.sum(h.astype(jnp.float32) * w5.astype(jnp.float32),
                    axis=-1, keepdims=True) + b5
        return q

    # Reference 2: full-f32 math (original PyTorch forward semantics).
    def ref_f32(x, a, params):
        h = jnp.concatenate([x, a], axis=1)
        for i, (w, b) in enumerate(params):
            h = h @ w.T + b
            if i < len(params) - 1:
                h = jnp.where(h > 0, h, 0.01 * h)
        return h

    q_ref = ref_kernel_math(x, action_c, params)
    q_f32 = ref_f32(x, action_c, params)
    assert jnp.allclose(q, q_ref, atol=2e-2, rtol=2e-2), (
        "max diff vs kernel-math ref: %s" % jnp.max(jnp.abs(q - q_ref)))
    assert jnp.allclose(q, q_f32, atol=1.5e-1, rtol=1.5e-1), (
        "max diff vs f32 ref: %s" % jnp.max(jnp.abs(q - q_f32)))

    print("KERNEL_OK")
</pallas_src>

<mosaic_0001>
module attributes {stable_mosaic.version = 11 : i64} {
  func.func @kernel(%arg0: i32, %arg1: memref<16x32xbf16, #tpu.memory_space<vmem>>, %arg2: memref<32x512xbf16, #tpu.memory_space<vmem>>, %arg3: memref<512x256xbf16, #tpu.memory_space<vmem>>, %arg4: memref<256x128xbf16, #tpu.memory_space<vmem>>, %arg5: memref<128x64xbf16, #tpu.memory_space<vmem>>, %arg6: memref<1x1152xf32, #tpu.memory_space<vmem>>, %arg7: memref<16x1xf32, #tpu.memory_space<vmem>>) attributes {dimension_semantics = [#tpu.dimension_semantics<parallel>], iteration_bounds = array<i64: 1>, scalar_prefetch = 0 : i64, scratch_operands = 0 : i64, tpu.core_type = #tpu.core_type<tc>, window_params = [{transform_indices = @transform_0, window_bounds = array<i64: 16, 32>}, {pipeline_mode = #tpu.pipeline_mode<synchronous>, transform_indices = @transform_1, window_bounds = array<i64: 32, 512>}, {pipeline_mode = #tpu.pipeline_mode<synchronous>, transform_indices = @transform_2, window_bounds = array<i64: 512, 256>}, {pipeline_mode = #tpu.pipeline_mode<synchronous>, transform_indices = @transform_3, window_bounds = array<i64: 256, 128>}, {pipeline_mode = #tpu.pipeline_mode<synchronous>, transform_indices = @transform_4, window_bounds = array<i64: 128, 64>}, {pipeline_mode = #tpu.pipeline_mode<synchronous>, transform_indices = @transform_5, window_bounds = array<i64: 1, 1152>}, {transform_indices = @transform_6, window_bounds = array<i64: 16, 1>}]} {
    %c0 = arith.constant 0 : index
    %c0_0 = arith.constant 0 : index
    %0 = vector.load %arg1[%c0, %c0_0] : memref<16x32xbf16, #tpu.memory_space<vmem>>, vector<16x32xbf16>
    %c0_1 = arith.constant 0 : index
    %c0_2 = arith.constant 0 : index
    %1 = vector.load %arg6[%c0_1, %c0_2] : memref<1x1152xf32, #tpu.memory_space<vmem>>, vector<1x512xf32>
    %c0_3 = arith.constant 0 : index
    %c0_4 = arith.constant 0 : index
    %2 = vector.load %arg2[%c0_3, %c0_4] : memref<32x512xbf16, #tpu.memory_space<vmem>>, vector<32x512xbf16>
    %cst = arith.constant dense<0.000000e+00> : vector<16x512xf32>
    %3 = tpu.matmul %0, %2, %cst {dimension_numbers = #tpu.dot_dimension_numbers<[1], [0], [0], [1], [0, 0, 1, 1], [], []>} : vector<16x32xbf16>, vector<32x512xbf16>, vector<16x512xf32> -> vector<16x512xf32>
    %4 = vector.broadcast %1 : vector<1x512xf32> to vector<16x512xf32>
    %5 = arith.addf %3, %4 : vector<16x512xf32>
    %cst_5 = arith.constant 0.00999999977 : f32
    %6 = vector.broadcast %cst_5 : f32 to vector<16x512xf32>
    %7 = arith.mulf %6, %5 : vector<16x512xf32>
    %8 = arith.maximumf %5, %7 : vector<16x512xf32>
    %9 = arith.truncf %8 : vector<16x512xf32> to vector<16x512xbf16>
    %c0_6 = arith.constant 0 : index
    %c512 = arith.constant 512 : index
    %10 = vector.load %arg6[%c0_6, %c512] : memref<1x1152xf32, #tpu.memory_space<vmem>>, vector<1x256xf32>
    %c0_7 = arith.constant 0 : index
    %c0_8 = arith.constant 0 : index
    %11 = vector.load %arg3[%c0_7, %c0_8] : memref<512x256xbf16, #tpu.memory_space<vmem>>, vector<512x256xbf16>
    %cst_9 = arith.constant dense<0.000000e+00> : vector<16x256xf32>
    %12 = tpu.matmul %9, %11, %cst_9 {dimension_numbers = #tpu.dot_dimension_numbers<[1], [0], [0], [1], [0, 0, 1, 1], [], []>} : vector<16x512xbf16>, vector<512x256xbf16>, vector<16x256xf32> -> vector<16x256xf32>
    %13 = vector.broadcast %10 : vector<1x256xf32> to vector<16x256xf32>
    %14 = arith.addf %12, %13 : vector<16x256xf32>
    %cst_10 = arith.constant 0.00999999977 : f32
    %15 = vector.broadcast %cst_10 : f32 to vector<16x256xf32>
    %16 = arith.mulf %15, %14 : vector<16x256xf32>
    %17 = arith.maximumf %14, %16 : vector<16x256xf32>
    %18 = arith.truncf %17 : vector<16x256xf32> to vector<16x256xbf16>
    %c0_11 = arith.constant 0 : index
    %c768 = arith.constant 768 : index
    %19 = vector.load %arg6[%c0_11, %c768] : memref<1x1152xf32, #tpu.memory_space<vmem>>, vector<1x128xf32>
    %c0_12 = arith.constant 0 : index
    %c0_13 = arith.constant 0 : index
    %20 = vector.load %arg4[%c0_12, %c0_13] : memref<256x128xbf16, #tpu.memory_space<vmem>>, vector<256x128xbf16>
    %cst_14 = arith.constant dense<0.000000e+00> : vector<16x128xf32>
    %21 = tpu.matmul %18, %20, %cst_14 {dimension_numbers = #tpu.dot_dimension_numbers<[1], [0], [0], [1], [0, 0, 1, 1], [], []>} : vector<16x256xbf16>, vector<256x128xbf16>, vector<16x128xf32> -> vector<16x128xf32>
    %22 = vector.broadcast %19 : vector<1x128xf32> to vector<16x128xf32>
    %23 = arith.addf %21, %22 : vector<16x128xf32>
    %cst_15 = arith.constant 0.00999999977 : f32
    %24 = vector.broadcast %cst_15 : f32 to vector<16x128xf32>
    %25 = arith.mulf %24, %23 : vector<16x128xf32>
    %26 = arith.maximumf %23, %25 : vector<16x128xf32>
    %27 = arith.truncf %26 : vector<16x128xf32> to vector<16x128xbf16>
    %c0_16 = arith.constant 0 : index
    %c896 = arith.constant 896 : index
    %28 = vector.load %arg6[%c0_16, %c896] : memref<1x1152xf32, #tpu.memory_space<vmem>>, vector<1x64xf32>
    %c0_17 = arith.constant 0 : index
    %c0_18 = arith.constant 0 : index
    %29 = vector.load %arg5[%c0_17, %c0_18] : memref<128x64xbf16, #tpu.memory_space<vmem>>, vector<128x64xbf16>
    %cst_19 = arith.constant dense<0.000000e+00> : vector<16x64xf32>
    %30 = tpu.matmul %27, %29, %cst_19 {dimension_numbers = #tpu.dot_dimension_numbers<[1], [0], [0], [1], [0, 0, 1, 1], [], []>} : vector<16x128xbf16>, vector<128x64xbf16>, vector<16x64xf32> -> vector<16x64xf32>
    %31 = vector.broadcast %28 : vector<1x64xf32> to vector<16x64xf32>
    %32 = arith.addf %30, %31 : vector<16x64xf32>
    %cst_20 = arith.constant 0.00999999977 : f32
    %33 = vector.broadcast %cst_20 : f32 to vector<16x64xf32>
    %34 = arith.mulf %33, %32 : vector<16x64xf32>
    %35 = arith.maximumf %32, %34 : vector<16x64xf32>
    %36 = arith.truncf %35 : vector<16x64xf32> to vector<16x64xbf16>
    %c0_21 = arith.constant 0 : index
    %c1024 = arith.constant 1024 : index
    %37 = vector.load %arg6[%c0_21, %c1024] : memref<1x1152xf32, #tpu.memory_space<vmem>>, vector<1x64xf32>
    %38 = arith.extf %36 : vector<16x64xbf16> to vector<16x64xf32>
    %39 = vector.broadcast %37 : vector<1x64xf32> to vector<16x64xf32>
    %40 = arith.mulf %38, %39 : vector<16x64xf32>
    %cst_22 = arith.constant dense<0.000000e+00> : vector<16xf32>
    %41 = vector.multi_reduction <add>, %40, %cst_22 [1] : vector<16x64xf32> to vector<16xf32>
    %42 = vector.shape_cast %41 : vector<16xf32> to vector<16x1xf32>
    %c0_23 = arith.constant 0 : index
    %c1088 = arith.constant 1088 : index
    %43 = vector.load %arg6[%c0_23, %c1088] : memref<1x1152xf32, #tpu.memory_space<vmem>>, vector<1x1xf32>
    %44 = vector.broadcast %43 : vector<1x1xf32> to vector<16x1xf32>
    %45 = arith.addf %42, %44 : vector<16x1xf32>
    %c0_24 = arith.constant 0 : index
    %c0_25 = arith.constant 0 : index
    %46 = vector.load %arg7[%c0_24, %c0_25] : memref<16x1xf32, #tpu.memory_space<vmem>>, vector<16x1xf32>
    tpu.vector_store %arg7[%c0_24, %c0_25], %45 {strides = array<i32>} : memref<16x1xf32, #tpu.memory_space<vmem>>, vector<16x1xf32>,
    return
  }
  func.func @transform_0(%arg0: i32) -> (i32, i32) {
    %c0_i32 = arith.constant 0 : i32
    %c0_i32_0 = arith.constant 0 : i32
    return %arg0, %c0_i32 : i32, i32
  }
  func.func @transform_1(%arg0: i32) -> (i32, i32) {
    %c0_i32 = arith.constant 0 : i32
    %c0_i32_0 = arith.constant 0 : i32
    %c0_i32_1 = arith.constant 0 : i32
    return %c0_i32, %c0_i32_0 : i32, i32
  }
  func.func @transform_2(%arg0: i32) -> (i32, i32) {
    %c0_i32 = arith.constant 0 : i32
    %c0_i32_0 = arith.constant 0 : i32
    %c0_i32_1 = arith.constant 0 : i32
    return %c0_i32, %c0_i32_0 : i32, i32
  }
  func.func @transform_3(%arg0: i32) -> (i32, i32) {
    %c0_i32 = arith.constant 0 : i32
    %c0_i32_0 = arith.constant 0 : i32
    %c0_i32_1 = arith.constant 0 : i32
    return %c0_i32, %c0_i32_0 : i32, i32
  }
  func.func @transform_4(%arg0: i32) -> (i32, i32) {
    %c0_i32 = arith.constant 0 : i32
    %c0_i32_0 = arith.constant 0 : i32
    %c0_i32_1 = arith.constant 0 : i32
    return %c0_i32, %c0_i32_0 : i32, i32
  }
  func.func @transform_5(%arg0: i32) -> (i32, i32) {
    %c0_i32 = arith.constant 0 : i32
    %c0_i32_0 = arith.constant 0 : i32
    %c0_i32_1 = arith.constant 0 : i32
    return %c0_i32, %c0_i32_0 : i32, i32
  }
  func.func @transform_6(%arg0: i32) -> (i32, i32) {
    %c0_i32 = arith.constant 0 : i32
    %c0_i32_0 = arith.constant 0 : i32
    return %arg0, %c0_i32 : i32, i32
  }
}

</mosaic_0001>

<bundles_post_ra>
// kernel: tpu_custom_call.1
= control target key start
LH: loop header
LB: loop body
LE: loop exit
PB: predicated region body
PF: predicated region fallthrough
CT: control target
= control target key end

     0   :  { %11 = vsyncpa [#allocation3], 0  ;;  %s1713_s0 = inlined_call_operand.vmem [shape: bf16[16,32], index: 0, kind: input, shape index: {}]   ;;  %s1714_s1 = inlined_call_operand.vmem [shape: bf16[32,512], index: 1, kind: input, shape index: {}]   ;;  %s1715_s2 = inlined_call_operand.hbm [shape: bf16[512,256], index: 2, kind: input, shape index: {}]   ;;  %s1716_s3 = inlined_call_operand.hbm [shape: bf16[256,128], index: 3, kind: input, shape index: {}]   ;;  %s1717_s4 = inlined_call_operand.vmem [shape: bf16[128,64], index: 4, kind: input, shape index: {}]   ;;  %s1718_s5 = inlined_call_operand.vmem [shape: f32[1,1152], index: 5, kind: input, shape index: {}]   ;;  %s1719_s6 = inlined_call_operand.vmem [shape: f32[16,1], index: 6, kind: output, shape index: {}]  }
   0x1   :  { %s21_s23 = sshll.u32 %s1715_s2, 4  ;;  %s22_s23 = int_to_ptr.hbm [resolvable:$true] %s21_s23 }
   0x2   :  { %12 = vsyncpa [#allocation5], 0  ;;  %s1550_s24 = smov [#allocation2]   ;;  %s34_s28 = sshll.u32 %s1716_s3, 4  ;;  %s35_s28 = int_to_ptr.hbm [resolvable:$true] %s34_s28 }
   0x3   :  { %s23_s25 = sshll.u32 %s1550_s24, 4  ;;  %s1551_s29 = smov 128   ;;  %s24_s25 = int_to_ptr.vmem [resolvable:$true] %s23_s25 }
   0x4   :  { %s1552_s30 = smov 8   ;;  %s1553_s7 = smov [#allocation4]  }
   0x5   :  { %29 = dma.hbm_to_vmem [thread:$0]  %s22_s23, 8192, %s24_s25, [#allocation3], %s1551_s29, %s1551_s29, %s1552_s30  }
   0x6   :  { %s36_s8 = sshll.u32 %s1553_s7, 4  ;;  %s1554_s9 = smov 64   ;;  %s37_s8 = int_to_ptr.vmem [resolvable:$true] %s36_s8 }
   0x7   :  { %s1555_s10 = smov 4  }
   0x8   :  { %42 = dma.hbm_to_vmem [thread:$0]  %s35_s28, 2048, %s37_s8, [#allocation5], %s1554_s9, %s1554_s9, %s1555_s10  }
   0x9   :  { %1546 = dma.done.wait [#allocation3], 8192  }
   0xa   :  { %1547 = vsyncadd [#allocation3], 4294959104 }
   0xb   :  { %1548 = dma.done.wait [#allocation5], 2048  }
   0xc   :  { %1549 = vsyncadd [#allocation5], 4294965248  ;;  %v1022_v0 = vld [vmem:[%s1714_s1 + $0x20] sm:$0xf]  ;;  %v1399_v1 = vld [vmem:[%s1714_s1 + $0x2c] sm:$0xf0] }
   0xd   :  { %v1397_v2 = vld [vmem:[%s1714_s1 + $0x24] sm:$0xf]  ;;  %v1023_v3 = vor.u32 %v1399_v1, %v1022_v0  ;;  %v1024_v4 = vld [vmem:[%s1714_s1 + $0x30] sm:$0xf0]  ;;  %v1030_v5 = vld [vmem:[%s1714_s1 + $0x28] sm:$0xf] }
   0xe   :  { %v1400_v6 = vld [vmem:[%s1714_s1 + $0x34] sm:$0xf0]  ;;  %v1027_v7 = vor.u32 %v1397_v2, %v1024_v4  ;;  %v1006_v9 = vld [vmem:[%s1714_s1] sm:$0xf]  ;;  %v1395_v10 = vld [vmem:[%s1714_s1 + $0xc] sm:$0xf0] }
   0xf   :  { %v1031_v8 = vor.u32 %v1400_v6, %v1030_v5  ;;  %v1393_v11 = vld [vmem:[%s1714_s1 + $0x4] sm:$0xf]  ;;  %131 = vmatpush.bf16.msra.mxu3 %v1023_v3  ;;  %v1007_v12 = vor.u32 %v1395_v10, %v1006_v9  ;;  %v1008_v13 = vld [vmem:[%s1714_s1 + $0x10] sm:$0xf0]  ;;  %v1014_v14 = vld [vmem:[%s1714_s1 + $0x8] sm:$0xf] }
  0x10   :  { %v1396_v15 = vld [vmem:[%s1714_s1 + $0x14] sm:$0xf0]  ;;  %145 = vmatpush.bf16.msra.mxu1 %v1027_v7  ;;  %v1011_v16 = vor.u32 %v1393_v11, %v1008_v13  ;;  %v1638_v18 = vld [vmem:[%s1713_s0] sm:$0xff]  ;;  %vm121_vm0 = vcmask 261120   ;;  %v1398_v19 = vld [vmem:[%s1714_s1 + $0x2c] sm:$0xf] }
  0x11   :  { %159 = vmatpush.bf16.msra.mxu2 %v1031_v8  ;;  %v1015_v17 = vor.u32 %v1396_v15, %v1014_v14  ;;  %v1032_v20 = vld [vmem:[%s1714_s1 + $0x38] sm:$0xf0]  ;;  %v1394_v22 = vld [vmem:[%s1714_s1 + $0xc] sm:$0xf]  ;;  %v1162_v24 = vld [vmem:[#allocation2 + $0xf0] sm:$0xf] }
  0x12   :  { %v1035_v21 = vor.u32 %v1398_v19, %v1032_v20  ;;  %v1016_v23 = vld [vmem:[%s1714_s1 + $0x18] sm:$0xf0]  ;;  %v1432_v25 = vld [vmem:[#allocation2 + $0xf4] sm:$0xf0]  ;;  %v1154_v26 = vld [vmem:[#allocation2 + $0xe0] sm:$0xf] }
  0x13   :  { %v1430_v27 = vld [vmem:[#allocation2 + $0xe4] sm:$0xf0]  ;;  %132 = vmatpush.bf16.msra.mxu3 %v1007_v12  ;;  %v1163_v28 = vor.u32 %v1432_v25, %v1162_v24  ;;  %v1098_v29 = vld [vmem:[#allocation2 + $0x70] sm:$0xf]  ;;  %v1416_v30 = vld [vmem:[#allocation2 + $0x74] sm:$0xf0]  ;;  %v1019_v34 = vor.u32 %v1394_v22, %v1016_v23 }
  0x14   :  { %v1226_v31 = vld [vmem:[#allocation2 + $0x170] sm:$0xf]  ;;  %146 = vmatpush.bf16.msra.mxu1 %v1011_v16  ;;  %v1099_v32 = vor.u32 %v1416_v30, %v1098_v29  ;;  %v1448_v33 = vld [vmem:[#allocation2 + $0x174] sm:$0xf0]  ;;  %v1155_v35 = vor.u32 %v1430_v27, %v1154_v26  ;;  %v1090_v37 = vld [vmem:[#allocation2 + $0x60] sm:$0xf] }
  0x15   :  { %160 = vmatpush.bf16.msra.mxu2 %v1015_v17  ;;  %v1227_v36 = vor.u32 %v1448_v33, %v1226_v31  ;;  %v1414_v38 = vld [vmem:[#allocation2 + $0x64] sm:$0xf0]  ;;  %v1218_v39 = vld [vmem:[#allocation2 + $0x160] sm:$0xf]  ;;  %v1146_v40 = vld [vmem:[#allocation2 + $0xd0] sm:$0xf] }
  0x16   :  { %1036 = vmatmul.msk.bf16.vlgmr.msra.gmra.mxu3 %vm121_vm0, %v1638_v18  ;;  %591 = vmatpush.bf16.msra.mxu0 %v1099_v32  ;;  %v1428_v41 = vld [vmem:[#allocation2 + $0xd4] sm:$0xf0]  ;;  %v1091_v42 = vor.u32 %v1414_v38, %v1090_v37  ;;  %v1446_v43 = vld [vmem:[#allocation2 + $0x164] sm:$0xf0]  ;;  %v1082_v44 = vld [vmem:[#allocation2 + $0x50] sm:$0xf] }
  0x17   :  { %173 = vmatpush.bf16.msrb.mxu3 %v1035_v21  ;;  %1037 = vmatmul.msk.bf16.vlgmr.msra.gmra.mxu1 %vm121_vm0, %v1638_v18  ;;  %v1412_v45 = vld [vmem:[#allocation2 + $0x54] sm:$0xf0]  ;;  %v1219_v46 = vor.u32 %v1446_v43, %v1218_v39  ;;  %v1147_v47 = vor.u32 %v1428_v41, %v1146_v40  ;;  %v1210_v48 = vld [vmem:[#allocation2 + $0x150] sm:$0xf]  ;;  %v1138_v50 = vld [vmem:[#allocation2 + $0xc0] sm:$0xf] }
  0x18   :  { %605 = vmatpush.bf16.msrb.mxu1 %v1163_v28  ;;  %1038 = vmatmul.msk.bf16.vlgmr.msra.gmra.mxu2 %vm121_vm0, %v1638_v18  ;;  %v1444_v49 = vld [vmem:[#allocation2 + $0x154] sm:$0xf0]  ;;  %v1426_v51 = vld [vmem:[#allocation2 + $0xc4] sm:$0xf0]  ;;  %v1083_v52 = vor.u32 %v1412_v45, %v1082_v44  ;;  %v1074_v53 = vld [vmem:[#allocation2 + $0x40] sm:$0xf] }
  0x19   :  { %619 = vmatpush.bf16.msrb.mxu2 %v1227_v36  ;;  %v1410_v54 = vld [vmem:[#allocation2 + $0x44] sm:$0xf0]  ;;  %v1211_v55 = vor.u32 %v1444_v49, %v1210_v48  ;;  %v1290_v56 = vld [vmem:[#allocation2 + $0x1f0] sm:$0xf]  ;;  %v1464_v57 = vld [vmem:[#allocation2 + $0x1f4] sm:$0xf0]  ;;  %v1139_v58 = vor.u32 %v1426_v51, %v1138_v50 }
  0x1a   :  { %592 = vmatpush.bf16.msra.mxu0 %v1091_v42  ;;  %v1202_v59 = vld [vmem:[#allocation2 + $0x140] sm:$0xf]  ;;  %v1442_v60 = vld [vmem:[#allocation2 + $0x144] sm:$0xf0]  ;;  %v1291_v61 = vor.u32 %v1464_v57, %v1290_v56  ;;  %v1130_v62 = vld [vmem:[#allocation2 + $0xb0] sm:$0xf]  ;;  %v1075_v0 = vor.u32 %v1410_v54, %v1074_v53 }
  0x1b   :  { %174 = vmatpush.bf16.msrb.mxu3 %v1019_v34  ;;  %v1424_v63 = vld [vmem:[#allocation2 + $0xb4] sm:$0xf0]  ;;  %v1066_v1 = vld [vmem:[#allocation2 + $0x30] sm:$0xf]  ;;  %v1282_v3 = vld [vmem:[#allocation2 + $0x1e0] sm:$0xf]  ;;  %v1203_v5 = vor.u32 %v1442_v60, %v1202_v59 }
  0x1c   :  { %606 = vmatpush.bf16.msrb.mxu1 %v1155_v35  ;;  %v1408_v2 = vld [vmem:[#allocation2 + $0x34] sm:$0xf0]  ;;  %v1462_v4 = vld [vmem:[#allocation2 + $0x1e4] sm:$0xf0]  ;;  %v1131_v7 = vor.u32 %v1424_v63, %v1130_v62  ;;  %v1194_v8 = vld [vmem:[#allocation2 + $0x130] sm:$0xf] }
  0x1d   :  { %620 = vmatpush.bf16.msrb.mxu2 %v1219_v46  ;;  %v1283_v6 = vor.u32 %v1462_v4, %v1282_v3  ;;  %v1440_v9 = vld [vmem:[#allocation2 + $0x134] sm:$0xf0]  ;;  %v1122_v10 = vld [vmem:[#allocation2 + $0xa0] sm:$0xf]  ;;  %v1422_v11 = vld [vmem:[#allocation2 + $0xa4] sm:$0xf0]  ;;  %v1067_v12 = vor.u32 %v1408_v2, %v1066_v1 }
  0x1e   :  { %593 = vmatpush.bf16.msra.mxu0 %v1083_v52  ;;  %v1058_v13 = vld [vmem:[#allocation2 + $0x20] sm:$0xf]  ;;  %v1406_v14 = vld [vmem:[#allocation2 + $0x24] sm:$0xf0]  ;;  %v1195_v15 = vor.u32 %v1440_v9, %v1194_v8  ;;  %v1123_v16 = vor.u32 %v1422_v11, %v1122_v10  ;;  %v1114_v20 = vld [vmem:[#allocation2 + $0x90] sm:$0xf] }
  0x1f   :  { %633 = vmatpush.bf16.msra.mxu3 %v1291_v61  ;;  %v1186_v17 = vld [vmem:[#allocation2 + $0x120] sm:$0xf]  ;;  %v1438_v19 = vld [vmem:[#allocation2 + $0x124] sm:$0xf0]  ;;  %v1420_v21 = vld [vmem:[#allocation2 + $0x94] sm:$0xf0]  ;;  %v1059_v22 = vor.u32 %v1406_v14, %v1058_v13 }
  0x20   :  { %607 = vmatpush.bf16.msrb.mxu1 %v1147_v47  ;;  %v1187_v23 = vor.u32 %v1438_v19, %v1186_v17  ;;  %v1115_v24 = vor.u32 %v1420_v21, %v1114_v20  ;;  %v1106_v25 = vld [vmem:[#allocation2 + $0x80] sm:$0xf]  ;;  %v1418_v26 = vld [vmem:[#allocation2 + $0x84] sm:$0xf0]  ;;  %v1431_v28 = vld [vmem:[#allocation2 + $0xf4] sm:$0xf] }
  0x21   :  { %621 = vmatpush.bf16.msrb.mxu2 %v1211_v55  ;;  %v1107_v27 = vor.u32 %v1418_v26, %v1106_v25  ;;  %v1164_v29 = vld [vmem:[#allocation2 + $0xf8] sm:$0xf0]  ;;  %v1050_v31 = vld [vmem:[#allocation2 + $0x10] sm:$0xf]  ;;  %v1404_v32 = vld [vmem:[#allocation2 + $0x14] sm:$0xf0] }
  0x22   :  { %594 = vmatpush.bf16.msra.mxu0 %v1075_v0  ;;  %v1167_v30 = vor.u32 %v1431_v28, %v1164_v29  ;;  %v1051_v33 = vor.u32 %v1404_v32, %v1050_v31  ;;  %v1436_v34 = vld [vmem:[#allocation2 + $0x114] sm:$0xf0]  ;;  %v1274_v35 = vld [vmem:[#allocation2 + $0x1d0] sm:$0xf]  ;;  %v1429_v39 = vld [vmem:[#allocation2 + $0xe4] sm:$0xf] }
  0x23   :  { %634 = vmatpush.bf16.msra.mxu3 %v1283_v6  ;;  %v1460_v36 = vld [vmem:[#allocation2 + $0x1d4] sm:$0xf0]  ;;  %v1156_v40 = vld [vmem:[#allocation2 + $0xe8] sm:$0xf0]  ;;  %v1042_v42 = vld [vmem:[#allocation2] sm:$0xf] }
  0x24   :  { %608 = vmatpush.bf16.msrb.mxu1 %v1139_v58  ;;  %v1275_v38 = vor.u32 %v1460_v36, %v1274_v35  ;;  %v1159_v41 = vor.u32 %v1429_v39, %v1156_v40  ;;  %v1402_v43 = vld [vmem:[#allocation2 + $0x4] sm:$0xf0]  ;;  %v1170_v44 = vld [vmem:[#allocation2 + $0x100] sm:$0xf]  ;;  %v1415_v50 = vld [vmem:[#allocation2 + $0x74] sm:$0xf] }
  0x25   :  { %622 = vmatpush.bf16.msrb.mxu2 %v1203_v5  ;;  %v1043_v45 = vor.u32 %v1402_v43, %v1042_v42  ;;  %v1434_v46 = vld [vmem:[#allocation2 + $0x104] sm:$0xf0]  ;;  %v1266_v47 = vld [vmem:[#allocation2 + $0x1c0] sm:$0xf]  ;;  %v1100_v51 = vld [vmem:[#allocation2 + $0x78] sm:$0xf0] }
  0x26   :  { %1039 = vmatmul.msk.bf16.vlgmr.msrb.gmra.mxu3 %vm121_vm0, %v1638_v18  ;;  %595 = vmatpush.bf16.msra.mxu0 %v1067_v12  ;;  %v1178_v18 = vld [vmem:[#allocation2 + $0x110] sm:$0xf]  ;;  %v1171_v48 = vor.u32 %v1434_v46, %v1170_v44  ;;  %v1458_v49 = vld [vmem:[#allocation2 + $0x1c4] sm:$0xf0]  ;;  %v1103_v53 = vor.u32 %v1415_v50, %v1100_v51  ;;  %v1447_v54 = vld [vmem:[#allocation2 + $0x174] sm:$0xf] }
  0x27   :  { %v1179_v37 = vor.u32 %v1436_v34, %v1178_v18  ;;  %635 = vmatpush.bf16.msra.mxu3 %v1275_v38  ;;  %v1267_v52 = vor.u32 %v1458_v49, %v1266_v47  ;;  %v1228_v55 = vld [vmem:[#allocation2 + $0x178] sm:$0xf0]  ;;  %v1427_v56 = vld [vmem:[#allocation2 + $0xd4] sm:$0xf]  ;;  %v1258_v59 = vld [vmem:[#allocation2 + $0x1b0] sm:$0xf] }
  0x28   :  { %609 = vmatpush.bf16.msrb.mxu1 %v1131_v7  ;;  %v1231_v57 = vor.u32 %v1447_v54, %v1228_v55  ;;  %v1148_v58 = vld [vmem:[#allocation2 + $0xd8] sm:$0xf0]  ;;  %v1456_v60 = vld [vmem:[#allocation2 + $0x1b4] sm:$0xf0]  ;;  %v1413_v63 = vld [vmem:[#allocation2 + $0x64] sm:$0xf] }
  0x29   :  { %623 = vmatpush.bf16.msrb.mxu2 %v1195_v15  ;;  %v1151_v61 = vor.u32 %v1427_v56, %v1148_v58  ;;  %v1259_v62 = vor.u32 %v1456_v60, %v1258_v59  ;;  %v1092_v0 = vld [vmem:[#allocation2 + $0x68] sm:$0xf0]  ;;  %v1445_v1 = vld [vmem:[#allocation2 + $0x164] sm:$0xf]  ;;  %v1250_v8 = vld [vmem:[#allocation2 + $0x1a0] sm:$0xf] }
  0x2a   :  { %596 = vmatpush.bf16.msra.mxu0 %v1059_v22  ;;  %v1095_v2 = vor.u32 %v1413_v63, %v1092_v0  ;;  %v1220_v3 = vld [vmem:[#allocation2 + $0x168] sm:$0xf0]  ;;  %v1425_v5 = vld [vmem:[#allocation2 + $0xc4] sm:$0xf]  ;;  %v1454_v9 = vld [vmem:[#allocation2 + $0x1a4] sm:$0xf0] }
  0x2b   :  { %636 = vmatpush.bf16.msra.mxu3 %v1267_v52  ;;  %v1223_v4 = vor.u32 %v1445_v1, %v1220_v3  ;;  %v1140_v6 = vld [vmem:[#allocation2 + $0xc8] sm:$0xf0]  ;;  %v1251_v10 = vor.u32 %v1454_v9, %v1250_v8  ;;  %v1411_v11 = vld [vmem:[#allocation2 + $0x54] sm:$0xf]  ;;  %v1084_v12 = vld [vmem:[#allocation2 + $0x58] sm:$0xf0] }
  0x2c   :  { %610 = vmatpush.bf16.msrb.mxu1 %v1123_v16  ;;  %v1143_v7 = vor.u32 %v1425_v5, %v1140_v6  ;;  %v1443_v13 = vld [vmem:[#allocation2 + $0x154] sm:$0xf]  ;;  %v1087_v14 = vor.u32 %v1411_v11, %v1084_v12  ;;  %v1212_v15 = vld [vmem:[#allocation2 + $0x158] sm:$0xf0]  ;;  %v1242_v21 = vld [vmem:[#allocation2 + $0x190] sm:$0xf] }
  0x2d   :  { %624 = vmatpush.bf16.msrb.mxu2 %v1187_v23  ;;  %v1215_v16 = vor.u32 %v1443_v13, %v1212_v15  ;;  %v1423_v17 = vld [vmem:[#allocation2 + $0xb4] sm:$0xf]  ;;  %v1132_v19 = vld [vmem:[#allocation2 + $0xb8] sm:$0xf0]  ;;  %v1452_v22 = vld [vmem:[#allocation2 + $0x194] sm:$0xf0] }
  0x2e   :  { %597 = vmatpush.bf16.msra.mxu0 %v1051_v33  ;;  %v1135_v20 = vor.u32 %v1423_v17, %v1132_v19  ;;  %v1243_v23 = vor.u32 %v1452_v22, %v1242_v21  ;;  %v1076_v25 = vld [vmem:[#allocation2 + $0x48] sm:$0xf0]  ;;  %v1441_v26 = vld [vmem:[#allocation2 + $0x144] sm:$0xf]  ;;  %v1234_v18 = vld [vmem:[#allocation2 + $0x180] sm:$0xf] }
  0x2f   :  { %637 = vmatpush.bf16.msra.mxu3 %v1259_v62  ;;  %v1204_v28 = vld [vmem:[#allocation2 + $0x148] sm:$0xf0]  ;;  %v1450_v33 = vld [vmem:[#allocation2 + $0x184] sm:$0xf0]  ;;  %v1407_v35 = vld [vmem:[#allocation2 + $0x34] sm:$0xf] }
  0x30   :  { %611 = vmatpush.bf16.msrb.mxu1 %v1115_v24  ;;  %v1409_v24 = vld [vmem:[#allocation2 + $0x44] sm:$0xf]  ;;  %v1207_v29 = vor.u32 %v1441_v26, %v1204_v28  ;;  %v1124_v31 = vld [vmem:[#allocation2 + $0xa8] sm:$0xf0]  ;;  %v1235_v34 = vor.u32 %v1450_v33, %v1234_v18  ;;  %v1068_v36 = vld [vmem:[#allocation2 + $0x38] sm:$0xf0] }
  0x31   :  { %625 = vmatpush.bf16.msrb.mxu2 %v1179_v37  ;;  %v1439_v37 = vld [vmem:[#allocation2 + $0x134] sm:$0xf]  ;;  %v1071_v38 = vor.u32 %v1407_v35, %v1068_v36  ;;  %v1196_v39 = vld [vmem:[#allocation2 + $0x138] sm:$0xf0]  ;;  %v1405_v47 = vld [vmem:[#allocation2 + $0x24] sm:$0xf] }
  0x32   :  { %598 = vmatpush.bf16.msra.mxu0 %v1043_v45  ;;  %v1463_v40 = vld [vmem:[#allocation2 + $0x1f4] sm:$0xf]  ;;  %v1199_v42 = vor.u32 %v1439_v37, %v1196_v39  ;;  %v1116_v45 = vld [vmem:[#allocation2 + $0x98] sm:$0xf0]  ;;  %v1437_v49 = vld [vmem:[#allocation2 + $0x124] sm:$0xf] }
  0x33   :  { %638 = vmatpush.bf16.msra.mxu3 %v1251_v10  ;;  %v1419_v44 = vld [vmem:[#allocation2 + $0x94] sm:$0xf]  ;;  %v1188_v51 = vld [vmem:[#allocation2 + $0x128] sm:$0xf0]  ;;  %v1461_v52 = vld [vmem:[#allocation2 + $0x1e4] sm:$0xf] }
  0x34   :  { %612 = vmatpush.bf16.msrb.mxu1 %v1107_v27  ;;  %v1079_v27 = vor.u32 %v1409_v24, %v1076_v25  ;;  %v1119_v46 = vor.u32 %v1419_v44, %v1116_v45  ;;  %v1191_v54 = vor.u32 %v1437_v49, %v1188_v51  ;;  %v1417_v56 = vld [vmem:[#allocation2 + $0x84] sm:$0xf]  ;;  %v1663_v58 = vld [vmem:[%s1718_s5] sm:$0xf]  ;;  %v1403_v60 = vld [vmem:[#allocation2 + $0x14] sm:$0xf] }
  0x35   :  { %626 = vmatpush.bf16.msrb.mxu2 %v1171_v48  ;;  %v1060_v48 = vld [vmem:[#allocation2 + $0x28] sm:$0xf0]  ;;  %v1435_v62 = vld [vmem:[#allocation2 + $0x114] sm:$0xf]  ;;  %v1180_v0 = vld [vmem:[#allocation2 + $0x118] sm:$0xf0] }
  0x36   :  { %647 = vmatpush.bf16.msrb.mxu0 %v1103_v53  ;;  %v1063_v50 = vor.u32 %v1405_v47, %v1060_v48  ;;  %v1284_v53 = vld [vmem:[#allocation2 + $0x1e8] sm:$0xf0]  ;;  %v1459_v1 = vld [vmem:[#allocation2 + $0x1d4] sm:$0xf]  ;;  %v69_v3 = vperm.slane %v1663_v58, 1  ;;  %v70_v19 = vperm.slane %v1663_v58, 2 }
  0x37   :  { %639 = vmatpush.bf16.msra.mxu3 %v1243_v23  ;;  %v1287_v55 = vor.u32 %v1461_v52, %v1284_v53  ;;  %v1044_v8 = vld [vmem:[#allocation2 + $0x8] sm:$0xf0]  ;;  %v1433_v9 = vld [vmem:[#allocation2 + $0x104] sm:$0xf]  ;;  %v1260_v21 = vld [vmem:[#allocation2 + $0x1b8] sm:$0xf0] }
  0x38   :  { %661 = vmatpush.bf16.msra.mxu1 %v1167_v30  ;;  %v1421_v30 = vld [vmem:[#allocation2 + $0xa4] sm:$0xf]  ;;  %v1172_v11 = vld [vmem:[#allocation2 + $0x108] sm:$0xf0]  ;;  %v68_v22 = vperm.slane %v1663_v58, 0  ;;  %vm974_vm1 = vcmask 523264  }
  0x39   :  { %675 = vmatpush.bf16.msra.mxu2 %v1231_v57  ;;  %v1127_v32 = vor.u32 %v1421_v30, %v1124_v31  ;;  %v1108_v57 = vld [vmem:[#allocation2 + $0x88] sm:$0xf0]  ;;  %v1457_v12 = vld [vmem:[#allocation2 + $0x1c4] sm:$0xf]  ;;  %v1175_v15 = vor.u32 %v1433_v9, %v1172_v11  ;;  %v1244_v35 = vld [vmem:[#allocation2 + $0x198] sm:$0xf0] }
  0x3a   :  { %648 = vmatpush.bf16.msrb.mxu0 %v1095_v2  ;;  %v1111_v59 = vor.u32 %v1417_v56, %v1108_v57  ;;  %v1276_v2 = vld [vmem:[#allocation2 + $0x1d8] sm:$0xf0]  ;;  %v1268_v13 = vld [vmem:[#allocation2 + $0x1c8] sm:$0xf0]  ;;  %v1453_v26 = vld [vmem:[#allocation2 + $0x1a4] sm:$0xf] }
  0x3b   :  { %640 = vmatpush.bf16.msra.mxu3 %v1235_v34  ;;  %v1279_v5 = vor.u32 %v1459_v1, %v1276_v2  ;;  %v1451_v34 = vld [vmem:[#allocation2 + $0x194] sm:$0xf]  ;;  %v1449_v45 = vld [vmem:[#allocation2 + $0x184] sm:$0xf]  ;;  %v71_v57 = vperm.slane %v1663_v58, 3  ;;  %v1470_v58 = vld [vmem:[#allocation4 + $0x28] sm:$0xff] }
  0x3c   :  { %662 = vmatpush.bf16.msra.mxu1 %v1159_v41  ;;  %v1292_v41 = vld [vmem:[#allocation2 + $0x1f8] sm:$0xf0]  ;;  %v1479_v9 = vld [vmem:[#allocation4 + $0x70] sm:$0xff]  ;;  %v1478_v11 = vld [vmem:[#allocation4 + $0x68] sm:$0xff]  ;;  %vm991_vm2 = vcmask 7168  }
  0x3d   :  { %676 = vmatpush.bf16.msra.mxu2 %v1223_v4  ;;  %v1295_v43 = vor.u32 %v1463_v40, %v1292_v41  ;;  %v1183_v4 = vor.u32 %v1435_v62, %v1180_v0 }
  0x3e   :  { %649 = vmatpush.bf16.msrb.mxu0 %v1087_v14 }
  0x3f   :  { %689 = vmatpush.bf16.msrb.mxu3 %v1295_v43 }
  0x40   :  { %663 = vmatpush.bf16.msra.mxu1 %v1151_v61  ;;  %v1052_v61 = vld [vmem:[#allocation2 + $0x18] sm:$0xf0] }
  0x41   :  { %677 = vmatpush.bf16.msra.mxu2 %v1215_v16  ;;  %v1055_v63 = vor.u32 %v1403_v60, %v1052_v61  ;;  %v1271_v16 = vor.u32 %v1457_v12, %v1268_v13  ;;  %v1465_v12 = vld [vmem:[#allocation4] sm:$0xff] }
  0x42   :  { %650 = vmatpush.bf16.msrb.mxu0 %v1079_v27  ;;  %v1252_v27 = vld [vmem:[#allocation2 + $0x1a8] sm:$0xf0]  ;;  %v1477_v13 = vld [vmem:[#allocation4 + $0x60] sm:$0xff] }
  0x43   :  { %690 = vmatpush.bf16.msrb.mxu3 %v1287_v55 }
  0x44   :  { %664 = vmatpush.bf16.msra.mxu1 %v1143_v7  ;;  %v1401_v7 = vld [vmem:[#allocation2 + $0x4] sm:$0xf] }
  0x45   :  { %678 = vmatpush.bf16.msra.mxu2 %v1207_v29  ;;  %v1047_v10 = vor.u32 %v1401_v7, %v1044_v8  ;;  %v1480_v7 = vld [vmem:[#allocation4 + $0x78] sm:$0xff]  ;;  %v1467_v8 = vld [vmem:[#allocation4 + $0x10] sm:$0xff] }
  0x46   :  { %651 = vmatpush.bf16.msrb.mxu0 %v1071_v38 }
  0x47   :  { %691 = vmatpush.bf16.msrb.mxu3 %v1279_v5  ;;  %v1469_v5 = vld [vmem:[#allocation4 + $0x20] sm:$0xff] }
  0x48   :  { %665 = vmatpush.bf16.msra.mxu1 %v1135_v20  ;;  %v1455_v20 = vld [vmem:[#allocation2 + $0x1b4] sm:$0xf] }
  0x49   :  { %679 = vmatpush.bf16.msra.mxu2 %v1199_v42  ;;  %v1263_v24 = vor.u32 %v1455_v20, %v1260_v21  ;;  %v1247_v42 = vor.u32 %v1451_v34, %v1244_v35 }
  0x4a   :  { %652 = vmatpush.bf16.msrb.mxu0 %v1063_v50 }
  0x4b   :  { %692 = vmatpush.bf16.msrb.mxu3 %v1271_v16 }
  0x4c   :  { %666 = vmatpush.bf16.msra.mxu1 %v1127_v32  ;;  %v1255_v32 = vor.u32 %v1453_v26, %v1252_v27 }
  0x4d   :  { %680 = vmatpush.bf16.msra.mxu2 %v1191_v54 }
  0x4e   :  { %653 = vmatpush.bf16.msrb.mxu0 %v1055_v63 }
  0x4f   :  { %693 = vmatpush.bf16.msrb.mxu3 %v1263_v24 }
  0x50   :  { %667 = vmatpush.bf16.msra.mxu1 %v1119_v46  ;;  %v1236_v46 = vld [vmem:[#allocation2 + $0x188] sm:$0xf0] }
  0x51   :  { %681 = vmatpush.bf16.msra.mxu2 %v1183_v4  ;;  %v1239_v52 = vor.u32 %v1449_v45, %v1236_v46  ;;  %v1471_v4 = vld [vmem:[#allocation4 + $0x30] sm:$0xff] }
  0x52   :  { %654 = vmatpush.bf16.msrb.mxu0 %v1047_v10  ;;  %v1466_v10 = vld [vmem:[#allocation4 + $0x8] sm:$0xff] }
  0x53   :  { %694 = vmatpush.bf16.msrb.mxu3 %v1255_v32 }
  0x54   :  { %668 = vmatpush.bf16.msra.mxu1 %v1111_v59 }
  0x55   :  { %682 = vmatpush.bf16.msra.mxu2 %v1175_v15  ;;  %v1476_v15 = vld [vmem:[#allocation4 + $0x58] sm:$0xff] }
  0x57   :  { %695 = vmatpush.bf16.msrb.mxu3 %v1247_v42 }
  0x5b   :  { %696 = vmatpush.bf16.msrb.mxu3 %v1239_v52 }
  0x94   :  { %v148_v6 = vpop.f32.mrf.mxu1 }
  0x95   :  { %v149_v14 = vadd.f32 %v148_v6, %v69_v3  ;;  %v1468_v6 = vld [vmem:[#allocation4 + $0x18] sm:$0xff] }
  0x97   :  { %v182_v25 = vmul.f32 0.01, %v149_v14 }
  0x99   :  { %v134_v17 = vpop.f32.mrf.mxu3  ;;  %v190_v18 = vmax.f32 %v149_v14, %v182_v25  ;;  %v1473_v25 = vld [vmem:[#allocation4 + $0x40] sm:$0xff] }
  0x9a   :  { %v135_v31 = vadd.f32 %v134_v17, %v68_v22  ;;  %v1475_v17 = vld [vmem:[#allocation4 + $0x50] sm:$0xff] }
  0x9b   :  { %v162_v23 = vpop.f32.mrf.mxu2 }
  0x9c   :  { %v150_v28 = vpop.f32.mrf.mxu1  ;;  %v163_v29 = vadd.f32 %v162_v23, %v70_v19  ;;  %v181_v39 = vmul.f32 0.01, %v135_v31 }
  0x9d   :  { %v151_v30 = vadd.f32 %v150_v28, %v69_v3  ;;  %v1472_v3 = vld [vmem:[#allocation4 + $0x38] sm:$0xff] }
  0x9e   :  { %v183_v36 = vmul.f32 0.01, %v163_v29  ;;  %v189_v50 = vmax.f32 %v135_v31, %v181_v39 }
  0x9f   :  { %v186_v33 = vmul.f32 0.01, %v151_v30 }
  0xa0   :  { %v191_v48 = vmax.f32 %v163_v29, %v183_v36 }
  0xa1   :  { %v194_v37 = vmax.f32 %v151_v30, %v186_v33  ;;  %v136_v38 = vpop.f32.mrf.mxu3 }
  0xa2   :  { %v137_v40 = vadd.f32 %v136_v38, %v68_v22  ;;  %v1474_v22 = vld [vmem:[#allocation4 + $0x48] sm:$0xff] }
  0xa3   :  { %v164_v41 = vpop.f32.mrf.mxu2  ;;  %v198_v44 = vpack.c.bf16 %v194_v37, %v190_v18 }
  0xa4   :  { %v165_v43 = vadd.f32 %v164_v41, %v70_v19  ;;  %v185_v47 = vmul.f32 0.01, %v137_v40  ;;  %v201_v19 = vld [vmem:[%s1718_s5 + $0x4] sm:$0x3] }
  0xa5   :  { %613 = vmatmul.bf16.vlgmr.msrb.gmra.mxu1 %v198_v44  ;;  %v267_v21 = vperm.slane %v201_v19, 0  ;;  %v268_v36 = vperm.slane %v201_v19, 1 }
  0xa6   :  { %v187_v49 = vmul.f32 0.01, %v165_v43  ;;  %v193_v51 = vmax.f32 %v137_v40, %v185_v47  ;;  %859 = vmatpush.bf16.msrb.mxu1 %v1480_v7 }
  0xa8   :  { %v195_v53 = vmax.f32 %v165_v43, %v187_v49  ;;  %v197_v54 = vpack.c.bf16 %v193_v51, %v189_v50 }
  0xa9   :  { %v176_v55 = vpop.f32.mrf.mxu3 }
  0xaa   :  { %v199_v56 = vpack.c.bf16 %v195_v53, %v191_v48  ;;  %599 = vmatmul.bf16.vlgmr.msra.gmra.mxu0 %v197_v54  ;;  %v177_v59 = vadd.f32 %v176_v55, %v71_v57  ;;  %860 = vmatpush.bf16.msrb.mxu1 %v1479_v9 }
  0xab   :  { %845 = vmatpush.bf16.msra.mxu0 %v1472_v3  ;;  %v1485_v3 = vld [vmem:[%s1717_s4 + $0x20] sm:$0xff] }
  0xac   :  { %627 = vmatmul.bf16.vlgmr.msrb.gmra.mxu2 %v199_v56  ;;  %v184_v61 = vmul.f32 0.01, %v177_v59 }
  0xae   :  { %v192_v0 = vmax.f32 %v177_v59, %v184_v61  ;;  %861 = vmatpush.bf16.msrb.mxu1 %v1478_v11 }
  0xaf   :  { %846 = vmatpush.bf16.msra.mxu0 %v1471_v4  ;;  %v1484_v4 = vld [vmem:[%s1717_s4 + $0x18] sm:$0xff] }
  0xb1   :  { %v178_v60 = vpop.f32.mrf.mxu3 }
  0xb2   :  { %v179_v62 = vadd.f32 %v178_v60, %v71_v57  ;;  %862 = vmatpush.bf16.msrb.mxu1 %v1477_v13 }
  0xb3   :  { %847 = vmatpush.bf16.msra.mxu0 %v1470_v58  ;;  %v1483_v58 = vld [vmem:[%s1717_s4 + $0x10] sm:$0xff] }
  0xb4   :  { %v188_v63 = vmul.f32 0.01, %v179_v62 }
  0xb5   :  { %669 = vmatmul.bf16.vlgmr.msra.gmra.mxu1 %v198_v44 }
  0xb6   :  { %v196_v1 = vmax.f32 %v179_v62, %v188_v63  ;;  %863 = vmatpush.bf16.msrb.mxu1 %v1476_v15 }
  0xb7   :  { %848 = vmatpush.bf16.msra.mxu0 %v1469_v5  ;;  %v1482_v5 = vld [vmem:[%s1717_s4 + $0x8] sm:$0xff] }
  0xb8   :  { %v200_v2 = vpack.c.bf16 %v196_v1, %v192_v0  ;;  %v1488_v0 = vld [vmem:[%s1717_s4 + $0x38] sm:$0xff]  ;;  %v1487_v1 = vld [vmem:[%s1717_s4 + $0x30] sm:$0xff] }
  0xb9   :  { %946 = vmatpush.bf16.msrb.mxu2 %v1488_v0 }
  0xba   :  { %641 = vmatmul.bf16.vlgmr.msra.gmra.mxu3 %v200_v2  ;;  %655 = vmatmul.bf16.vlgmr.msrb.gmra.mxu0 %v197_v54 }
  0xbb   :  { %849 = vmatpush.bf16.msra.mxu0 %v1468_v6  ;;  %864 = vmatpush.bf16.msrb.mxu1 %v1475_v17  ;;  %v1481_v6 = vld [vmem:[%s1717_s4] sm:$0xff] }
  0xbc   :  { %683 = vmatmul.bf16.vlgmr.msra.gmra.mxu2 %v199_v56 }
  0xbd   :  { %947 = vmatpush.bf16.msrb.mxu2 %v1487_v1 }
  0xbf   :  { %850 = vmatpush.bf16.msra.mxu0 %v1467_v8  ;;  %865 = vmatpush.bf16.msrb.mxu1 %v1474_v22  ;;  %v1495_v8 = vld [vmem:[%s1718_s5 + $0x6] ss:$0 sm:$0xff]  ;;  %v1496_v22 = vld [vmem:[%s1718_s5 + $0x7] ss:$0 sm:$0xff] }
  0xc3   :  { %851 = vmatpush.bf16.msra.mxu0 %v1466_v10  ;;  %866 = vmatpush.bf16.msrb.mxu1 %v1473_v25 }
  0xc7   :  { %852 = vmatpush.bf16.msra.mxu0 %v1465_v12 }
  0xca   :  { %697 = vmatmul.bf16.vlgmr.msrb.gmra.mxu3 %v200_v2  ;;  %v1486_v2 = vld [vmem:[%s1717_s4 + $0x28] sm:$0xff] }
  0xcb   :  { %948 = vmatpush.bf16.msrb.mxu2 %v1486_v2 }
  0xcf   :  { %949 = vmatpush.bf16.msrb.mxu2 %v1485_v3 }
  0xd3   :  { %950 = vmatpush.bf16.msrb.mxu2 %v1484_v4 }
  0xd7   :  { %951 = vmatpush.bf16.msrb.mxu2 %v1483_v58 }
  0xdb   :  { %952 = vmatpush.bf16.msrb.mxu2 %v1482_v5 }
  0xdf   :  { %953 = vmatpush.bf16.msrb.mxu2 %v1481_v6 }
 0x122   :  { %v614_v16 = vpop.f32.mrf.mxu1 }
 0x127   :  { %v600_v14 = vpop.f32.mrf.mxu0 }
 0x128   :  { %v601_v24 = vadd.f32 %v600_v14, %v267_v21 }
 0x12a   :  { %v616_v26 = vpop.f32.mrf.mxu1  ;;  %v615_v29 = vadd.f32 %v614_v16, %v601_v24 }
 0x12f   :  { %v628_v20 = vpop.f32.mrf.mxu2  ;;  %v602_v23 = vpop.f32.mrf.mxu0 }
 0x130   :  { %v603_v30 = vadd.f32 %v602_v23, %v267_v21  ;;  %v629_v31 = vadd.f32 %v628_v20, %v615_v29 }
 0x132   :  { %v617_v18 = vadd.f32 %v616_v26, %v603_v30  ;;  %v670_v39 = vpop.f32.mrf.mxu1 }
 0x137   :  { %v630_v27 = vpop.f32.mrf.mxu2  ;;  %v656_v32 = vpop.f32.mrf.mxu0 }
 0x138   :  { %v631_v34 = vadd.f32 %v630_v27, %v617_v18  ;;  %v657_v42 = vadd.f32 %v656_v32, %v268_v36 }
 0x13a   :  { %v671_v48 = vadd.f32 %v670_v39, %v657_v42  ;;  %v672_v51 = vpop.f32.mrf.mxu1 }
 0x13d   :  { %v642_v28 = vpop.f32.mrf.mxu3 }
 0x13e   :  { %v643_v33 = vadd.f32 %v642_v28, %v629_v31  ;;  %v1497_v28 = vld [vmem:[%s1718_s5 + $0x8] ss:$0 sm:$0xff] }
 0x13f   :  { %v684_v40 = vpop.f32.mrf.mxu2  ;;  %v658_v45 = vpop.f32.mrf.mxu0 }
 0x140   :  { %v703_v37 = vmul.f32 0.01, %v643_v33  ;;  %v659_v49 = vadd.f32 %v658_v45, %v268_v36  ;;  %v685_v50 = vadd.f32 %v684_v40, %v671_v48 }
 0x142   :  { %v707_v43 = vmax.f32 %v643_v33, %v703_v37  ;;  %v673_v53 = vadd.f32 %v672_v51, %v659_v49 }
 0x145   :  { %v644_v35 = vpop.f32.mrf.mxu3 }
 0x146   :  { %v645_v38 = vadd.f32 %v644_v35, %v631_v34 }
 0x147   :  { %v686_v52 = vpop.f32.mrf.mxu2 }
 0x148   :  { %v705_v41 = vmul.f32 0.01, %v645_v38  ;;  %v687_v55 = vadd.f32 %v686_v52, %v673_v53 }
 0x14a   :  { %v709_v44 = vmax.f32 %v645_v38, %v705_v41 }
 0x14c   :  { %v711_v46 = vpack.c.bf16 %v709_v44, %v707_v43 }
 0x14d   :  { %v698_v47 = vpop.f32.mrf.mxu3 }
 0x14e   :  { %853 = vmatmul.bf16.vlgmr.msra.gmra.mxu0 %v711_v46  ;;  %v699_v54 = vadd.f32 %v698_v47, %v685_v50 }
 0x150   :  { %v704_v57 = vmul.f32 0.01, %v699_v54 }
 0x152   :  { %v708_v61 = vmax.f32 %v699_v54, %v704_v57 }
 0x155   :  { %v700_v56 = vpop.f32.mrf.mxu3 }
 0x156   :  { %v701_v59 = vadd.f32 %v700_v56, %v687_v55 }
 0x158   :  { %v706_v60 = vmul.f32 0.01, %v701_v59 }
 0x15a   :  { %v710_v62 = vmax.f32 %v701_v59, %v706_v60 }
 0x15c   :  { %v712_v63 = vpack.c.bf16 %v710_v62, %v708_v61 }
 0x15e   :  { %867 = vmatmul.bf16.vlgmr.msrb.gmra.mxu1 %v712_v63 }
 0x1cb   :  { %v854_v7 = vpop.f32.mrf.mxu0 }
 0x1cc   :  { %v855_v10 = vadd.f32 %v1495_v8, %v854_v7 }
 0x1d3   :  { %v856_v11 = vpop.f32.mrf.mxu0 }
 0x1d4   :  { %v857_v13 = vadd.f32 %v1495_v8, %v856_v11 }
 0x1db   :  { %v868_v9 = vpop.f32.mrf.mxu1 }
 0x1dc   :  { %v869_v12 = vadd.f32 %v868_v9, %v855_v10 }
 0x1de   :  { %v873_v15 = vmul.f32 0.01, %v869_v12 }
 0x1e0   :  { %v875_v19 = vmax.f32 %v869_v12, %v873_v15 }
 0x1e3   :  { %v870_v14 = vpop.f32.mrf.mxu1 }
 0x1e4   :  { %v871_v16 = vadd.f32 %v870_v14, %v857_v13 }
 0x1e6   :  { %v874_v17 = vmul.f32 0.01, %v871_v16 }
 0x1e8   :  { %v876_v20 = vmax.f32 %v871_v16, %v874_v17 }
 0x1ea   :  { %v877_v21 = vpack.c.bf16 %v876_v20, %v875_v19 }
 0x1ec   :  { %954 = vmatmul.bf16.vlgmr.msrb.gmra.mxu2 %v877_v21 }
 0x26f   :  { %v955_v23 = vpop.f32.mrf.mxu2 }
 0x270   :  { %v956_v24 = vadd.f32 %v1496_v22, %v955_v23 }
 0x272   :  { %v960_v25 = vmul.f32 0.01, %v956_v24 }
 0x274   :  { %v962_v26 = vmax.f32 %v956_v24, %v960_v25 }
 0x276   :  { %v964_v27 = vpack.c.bf16 %v962_v26, %v962_v26 }
 0x277   :  { %v957_v29 = vpop.f32.mrf.mxu2 }
 0x278   :  { %v967_v30 = vunpack.c.l.bf16 %v964_v27  ;;  %v958_v31 = vadd.f32 %v1496_v22, %v957_v29 }
 0x27a   :  { %v961_v32 = vmul.f32 0.01, %v958_v31  ;;  %v972_v18 = vmul.f32 %v1497_v28, %v967_v30 }
 0x27c   :  { %v963_v33 = vmax.f32 %v958_v31, %v961_v32  ;;  %v975_v34 = vsel %vm974_vm1, %v972_v18, 0.0 }
 0x27d   :  { %976 = vadd.xlane.f32.xlu0 %v975_v34 }
 0x27e   :  { %v965_v35 = vpack.c.bf16 %v963_v33, %v963_v33 }
 0x280   :  { %v968_v36 = vunpack.c.l.bf16 %v965_v35 }
 0x282   :  { %v973_v37 = vmul.f32 %v1497_v28, %v968_v36 }
 0x284   :  { %v978_v38 = vsel %vm974_vm1, %v973_v37, 0.0 }
 0x285   :  { %979 = vadd.xlane.f32.xlu0 %v978_v38 }
 0x2f0   :  { %v977_v39 = vpop.xlane.xlu0 %976 }
 0x2f1   :  { %v981_v40 = vadd.f32 %v1497_v28, %v977_v39 }
 0x2f3   :  { %985 = vrot.lane.b32.xlu1 %v981_v40, %s1554_s9 }
 0x2f8   :  { %v980_v41 = vpop.xlane.xlu0 %979 }
 0x2f9   :  { %v982_v42 = vadd.f32 %v1497_v28, %v980_v41 }
 0x2fb   :  { %987 = vrot.lane.b32.xlu1 %v982_v42, %s1554_s9 }
 0x365   :  { %v986_v43 = vpop.permute.xlu1 %985 }
 0x366   :  { %992 = vst.msk [vmem:[%s1719_s6] sm:$0xff] %vm991_vm2, %v986_v43 }
 0x36d   :  { %v988_v44 = vpop.permute.xlu1 %987 }
 0x36e   :  { %993 = vst.msk [vmem:[%s1719_s6 + $0x8] sm:$0xff] %vm991_vm2, %v988_v44 }
 0x36f   :  { %998 = vsyncpa [#allocation3], 1 }
 0x370   :  { %999 = vsyncpa [#allocation5], 1 }

</bundles_post_ra>
